<compile_context>
chip_gen: v7x
topology: tpu7x:2x2x1
jax: 0.10.0
libtpu: 0.0.40
codegen_flags: <defaults>
</compile_context>

<pallas_src>
import functools

import jax
import jax.numpy as jnp
from jax.experimental import pallas as pl
from jax.experimental.pallas import tpu as pltpu


_SUBLANE = 8            # sublane alignment for tiled (batch) axis
_LANE = 128             # lane width, for VMEM footprint accounting only
_MIN_ROWS_PER_CORE = 128  # split the batch across 2 cores once B >= 2*this


def _cdiv(a, b):
    return (a + b - 1) // b


def _round_up(n, m):
    return _cdiv(n, m) * m


def _vmem_tile_bytes(rows, cols, itemsize):
    """VMEM bytes of one (rows, cols) tile after (8, 128) layout padding."""
    return _round_up(rows, _SUBLANE) * _round_up(cols, _LANE) * itemsize


def metanet_kernel(x_ref, w1_ref, b1_ref, w2_ref, b2_ref, o_ref):
    # Hidden layer (MXU): [TB, D_in] @ [D_in, H], f32 accumulation.
    h = jnp.dot(x_ref[...], w1_ref[...], preferred_element_type=jnp.float32)
    # Bias broadcast [1, H] over the batch tile + ReLU (VPU, f32).
    h = jnp.maximum(h + b1_ref[...], 0.0)
    # Output layer (MXU): [TB, H] @ [H, D_out], f32 accumulation.
    y = jnp.dot(h.astype(w2_ref.dtype), w2_ref[...],
                preferred_element_type=jnp.float32)
    o_ref[...] = (y + b2_ref[...]).astype(o_ref.dtype)


@functools.partial(jax.jit, static_argnames=("block_b", "weight_bufs"))
def _metanet_forward(x, w1, b1, w2, b2, *, block_b, weight_bufs):
    B, D_in = x.shape
    H = w1.shape[1]
    D_out = w2.shape[1]

    # ---- batch tiling: the only tiled / padded axis -------------------------
    n_tiles = _cdiv(B, block_b)
    if n_tiles == 1 and B >= 2 * _MIN_ROWS_PER_CORE:
        n_tiles = 2                       # enough rows to occupy both v7x TCs
    if n_tiles > 1 and n_tiles % 2 == 1:
        n_tiles += 1                      # even step count -> balanced 2-TC split
    if n_tiles == 1:
        tb = B                            # full-dim block: exempt from 8-sublane rule
    else:
        tb = _round_up(_cdiv(B, n_tiles), _SUBLANE)   # <= 8*n_tiles-1 dead rows
    b_p = n_tiles * tb
    x_p = x if b_p == B else jnp.pad(x, ((0, b_p - B), (0, 0)))

    x_isz = jnp.dtype(x.dtype).itemsize
    w1_isz = jnp.dtype(w1.dtype).itemsize
    b1_isz = jnp.dtype(b1.dtype).itemsize
    w2_isz = jnp.dtype(w2.dtype).itemsize
    b2_isz = jnp.dtype(b2.dtype).itemsize
    out_isz = x_isz

    # ---- explicit VMEM budget: real block footprint + ~25% headroom ---------
    needed = (
        2 * _vmem_tile_bytes(tb, D_in, x_isz)            # streamed x, 2-deep
        + 2 * _vmem_tile_bytes(tb, D_out, out_isz)       # streamed out, 2-deep
        + weight_bufs * (_vmem_tile_bytes(D_in, H, w1_isz)
                         + _vmem_tile_bytes(1, H, b1_isz)
                         + _vmem_tile_bytes(H, D_out, w2_isz)
                         + _vmem_tile_bytes(1, D_out, b2_isz))
        + _vmem_tile_bytes(tb, H, 4)                     # f32 hidden intermediate
    )
    vmem_limit_bytes = min(max(int(needed * 1.25), 32 << 20), 100 << 20)

    # ---- cost estimate (per-operand dtypes) ----------------------------------
    flops = 2 * b_p * D_in * H + 2 * b_p * H * D_out
    bytes_accessed = (b_p * D_in * x_isz
                      + D_in * H * w1_isz + H * b1_isz
                      + H * D_out * w2_isz + D_out * b2_isz
                      + b_p * D_out * out_isz)

    # Resident weights: constant block index -> never re-fetched.  Single-buffer
    # them when supported (halves weight VMEM); fall back handled by the caller.
    w_kwargs = {"pipeline_mode": pl.Buffered(1)} if weight_bufs == 1 else {}

    out_p = pl.pallas_call(
        metanet_kernel,
        out_shape=jax.ShapeDtypeStruct((b_p, D_out), x.dtype),
        grid=(n_tiles,),
        in_specs=[
            # Activations stream over the batch grid axis.
            pl.BlockSpec((tb, D_in), lambda i: (i, 0)),
            # Weights / biases: full-dim blocks, resident in VMEM.
            pl.BlockSpec((D_in, H), lambda i: (0, 0), **w_kwargs),
            pl.BlockSpec((1, H), lambda i: (0, 0), **w_kwargs),
            pl.BlockSpec((H, D_out), lambda i: (0, 0), **w_kwargs),
            pl.BlockSpec((1, D_out), lambda i: (0, 0), **w_kwargs),
        ],
        out_specs=pl.BlockSpec((tb, D_out), lambda i: (i, 0)),
        compiler_params=pltpu.CompilerParams(
            dimension_semantics=("parallel",),      # batch is embarrassingly parallel
            vmem_limit_bytes=vmem_limit_bytes,
        ),
        cost_estimate=pl.CostEstimate(
            flops=flops, transcendentals=0, bytes_accessed=bytes_accessed),
    )(x_p, w1, b1, w2, b2)

    # Padded batch rows hold relu(b1)@W2 + b2 garbage; strip them.
    return out_p if b_p == B else out_p[:B]


def metanet_forward(x, w1, b1, w2, b2, *, block_b=512):
    """MetaNet forward:  relu(x @ W1 + b1) @ W2 + b2.

    x:  [B, D_in]
    w1: [D_in, H]   b1: [1, H]
    w2: [H, D_out]  b2: [1, D_out]
    returns [B, D_out]
    """
    try:
        return _metanet_forward(x, w1, b1, w2, b2,
                                block_b=block_b, weight_bufs=1)
    except Exception:
        # pipeline_mode=pl.Buffered(1) not supported by this jax/Mosaic build:
        # fall back to default double-buffered weights (identical semantics,
        # just more VMEM).
        return _metanet_forward(x, w1, b1, w2, b2,
                                block_b=block_b, weight_bufs=2)


def init_metanet_params(key, input_dim, output_dim, hidden_dim=None,
                        dtype=jnp.float32):
    """Deterministic parameter init mirroring MetaNet.__init__.

    Layer 0 (Linear(input_dim, hidden_dim)): weight & bias ~ N(0, 0.01).
    Layer 2 (Linear(hidden_dim, output_dim)): PyTorch default
        U(-1/sqrt(hidden_dim), 1/sqrt(hidden_dim)) for weight and bias.
    Weights are stored [in, out] (transpose of torch's [out, in]).
    """
    if hidden_dim is None:
        hidden_dim = max(input_dim // 4, output_dim)
    k1, k2, k3, k4 = jax.random.split(key, 4)
    w1 = 0.01 * jax.random.normal(k1, (input_dim, hidden_dim), dtype)
    b1 = 0.01 * jax.random.normal(k2, (1, hidden_dim), dtype)
    bound = 1.0 / (hidden_dim ** 0.5)
    w2 = jax.random.uniform(k3, (hidden_dim, output_dim), dtype,
                            minval=-bound, maxval=bound)
    b2 = jax.random.uniform(k4, (1, output_dim), dtype,
                            minval=-bound, maxval=bound)
    return w1, b1, w2, b2


if __name__ == "__main__":
    # Shapes consistent with the module: batch=8, input_dim=32, output_dim=4,
    # hidden_dim = max(32 // 4, 4) = 8.  Single grid step, zero padding/slicing.
    batch, input_dim, output_dim = 8, 32, 4

    key = jax.random.PRNGKey(0)
    kx, kp = jax.random.split(key)
    x = jax.random.normal(kx, (batch, input_dim), jnp.float32)
    w1, b1, w2, b2 = init_metanet_params(kp, input_dim, output_dim)

    out = jax.block_until_ready(metanet_forward(x, w1, b1, w2, b2))
    ref = jnp.maximum(x @ w1 + b1, 0.0) @ w2 + b2
    assert out.shape == (batch, output_dim)
    assert jnp.allclose(out, ref, atol=1e-5, rtol=1e-5)

    # Larger, non-divisible batch: exercises the multi-tile path (2 "parallel"
    # grid steps for the v7x 2-TC split, resident weights, only 4 padded rows).
    x2 = jax.random.normal(jax.random.fold_in(kx, 1), (300, input_dim),
                           jnp.float32)
    out2 = jax.block_until_ready(metanet_forward(x2, w1, b1, w2, b2))
    ref2 = jnp.maximum(x2 @ w1 + b1, 0.0) @ w2 + b2
    assert out2.shape == (300, output_dim)
    assert jnp.allclose(out2, ref2, atol=1e-5, rtol=1e-5)

    print("KERNEL_OK")
</pallas_src>

<mosaic_0001>
module attributes {stable_mosaic.version = 11 : i64} {
  func.func @metanet_kernel(%arg0: i32, %arg1: memref<8x32xf32, #tpu.memory_space<vmem>>, %arg2: memref<32x8xf32, #tpu.memory_space<vmem>>, %arg3: memref<1x8xf32, #tpu.memory_space<vmem>>, %arg4: memref<8x4xf32, #tpu.memory_space<vmem>>, %arg5: memref<1x4xf32, #tpu.memory_space<vmem>>, %arg6: memref<8x4xf32, #tpu.memory_space<vmem>>) attributes {dimension_semantics = [#tpu.dimension_semantics<parallel>], iteration_bounds = array<i64: 1>, scalar_prefetch = 0 : i64, scratch_operands = 0 : i64, tpu.core_type = #tpu.core_type<tc>, window_params = [{transform_indices = @transform_0, window_bounds = array<i64: 8, 32>}, {pipeline_mode = #tpu.pipeline_mode<synchronous>, transform_indices = @transform_1, window_bounds = array<i64: 32, 8>}, {pipeline_mode = #tpu.pipeline_mode<synchronous>, transform_indices = @transform_2, window_bounds = array<i64: 1, 8>}, {pipeline_mode = #tpu.pipeline_mode<synchronous>, transform_indices = @transform_3, window_bounds = array<i64: 8, 4>}, {pipeline_mode = #tpu.pipeline_mode<synchronous>, transform_indices = @transform_4, window_bounds = array<i64: 1, 4>}, {transform_indices = @transform_5, window_bounds = array<i64: 8, 4>}]} {
    %c0 = arith.constant 0 : index
    %c0_0 = arith.constant 0 : index
    %0 = vector.load %arg1[%c0, %c0_0] : memref<8x32xf32, #tpu.memory_space<vmem>>, vector<8x32xf32>
    %c0_1 = arith.constant 0 : index
    %c0_2 = arith.constant 0 : index
    %1 = vector.load %arg2[%c0_1, %c0_2] : memref<32x8xf32, #tpu.memory_space<vmem>>, vector<32x8xf32>
    %cst = arith.constant dense<0.000000e+00> : vector<8x8xf32>
    %2 = tpu.matmul %0, %1, %cst {dimension_numbers = #tpu.dot_dimension_numbers<[1], [0], [0], [1], [0, 0, 1, 1], [], []>} : vector<8x32xf32>, vector<32x8xf32>, vector<8x8xf32> -> vector<8x8xf32>
    %c0_3 = arith.constant 0 : index
    %c0_4 = arith.constant 0 : index
    %3 = vector.load %arg3[%c0_3, %c0_4] : memref<1x8xf32, #tpu.memory_space<vmem>>, vector<1x8xf32>
    %4 = vector.broadcast %3 : vector<1x8xf32> to vector<8x8xf32>
    %5 = arith.addf %2, %4 : vector<8x8xf32>
    %cst_5 = arith.constant 0.000000e+00 : f32
    %6 = vector.broadcast %cst_5 : f32 to vector<8x8xf32>
    %7 = arith.maximumf %5, %6 : vector<8x8xf32>
    %c0_6 = arith.constant 0 : index
    %c0_7 = arith.constant 0 : index
    %8 = vector.load %arg4[%c0_6, %c0_7] : memref<8x4xf32, #tpu.memory_space<vmem>>, vector<8x4xf32>
    %cst_8 = arith.constant dense<0.000000e+00> : vector<8x4xf32>
    %9 = tpu.matmul %7, %8, %cst_8 {dimension_numbers = #tpu.dot_dimension_numbers<[1], [0], [0], [1], [0, 0, 1, 1], [], []>} : vector<8x8xf32>, vector<8x4xf32>, vector<8x4xf32> -> vector<8x4xf32>
    %c0_9 = arith.constant 0 : index
    %c0_10 = arith.constant 0 : index
    %10 = vector.load %arg5[%c0_9, %c0_10] : memref<1x4xf32, #tpu.memory_space<vmem>>, vector<1x4xf32>
    %11 = vector.broadcast %10 : vector<1x4xf32> to vector<8x4xf32>
    %12 = arith.addf %9, %11 : vector<8x4xf32>
    %c0_11 = arith.constant 0 : index
    %c0_12 = arith.constant 0 : index
    %13 = vector.load %arg6[%c0_11, %c0_12] : memref<8x4xf32, #tpu.memory_space<vmem>>, vector<8x4xf32>
    tpu.vector_store %arg6[%c0_11, %c0_12], %12 {strides = array<i32>} : memref<8x4xf32, #tpu.memory_space<vmem>>, vector<8x4xf32>,
    return
  }
  func.func @transform_0(%arg0: i32) -> (i32, i32) {
    %c0_i32 = arith.constant 0 : i32
    %c0_i32_0 = arith.constant 0 : i32
    return %arg0, %c0_i32 : i32, i32
  }
  func.func @transform_1(%arg0: i32) -> (i32, i32) {
    %c0_i32 = arith.constant 0 : i32
    %c0_i32_0 = arith.constant 0 : i32
    %c0_i32_1 = arith.constant 0 : i32
    return %c0_i32, %c0_i32_0 : i32, i32
  }
  func.func @transform_2(%arg0: i32) -> (i32, i32) {
    %c0_i32 = arith.constant 0 : i32
    %c0_i32_0 = arith.constant 0 : i32
    %c0_i32_1 = arith.constant 0 : i32
    return %c0_i32, %c0_i32_0 : i32, i32
  }
  func.func @transform_3(%arg0: i32) -> (i32, i32) {
    %c0_i32 = arith.constant 0 : i32
    %c0_i32_0 = arith.constant 0 : i32
    %c0_i32_1 = arith.constant 0 : i32
    return %c0_i32, %c0_i32_0 : i32, i32
  }
  func.func @transform_4(%arg0: i32) -> (i32, i32) {
    %c0_i32 = arith.constant 0 : i32
    %c0_i32_0 = arith.constant 0 : i32
    %c0_i32_1 = arith.constant 0 : i32
    return %c0_i32, %c0_i32_0 : i32, i32
  }
  func.func @transform_5(%arg0: i32) -> (i32, i32) {
    %c0_i32 = arith.constant 0 : i32
    %c0_i32_0 = arith.constant 0 : i32
    return %arg0, %c0_i32 : i32, i32
  }
}

module attributes {stable_mosaic.version = 11 : i64} {
  func.func @metanet_kernel(%arg0: i32, %arg1: memref<8x32xf32, #tpu.memory_space<vmem>>, %arg2: memref<32x8xf32, #tpu.memory_space<vmem>>, %arg3: memref<1x8xf32, #tpu.memory_space<vmem>>, %arg4: memref<8x4xf32, #tpu.memory_space<vmem>>, %arg5: memref<1x4xf32, #tpu.memory_space<vmem>>, %arg6: memref<8x4xf32, #tpu.memory_space<vmem>>) attributes {dimension_semantics = [#tpu.dimension_semantics<parallel>], iteration_bounds = array<i64: 1>, scalar_prefetch = 0 : i64, scratch_operands = 0 : i64, tpu.core_type = #tpu.core_type<tc>, window_params = [{transform_indices = @transform_0, window_bounds = array<i64: 8, 32>}, {pipeline_mode = #tpu.pipeline_mode<synchronous>, transform_indices = @transform_1, window_bounds = array<i64: 32, 8>}, {pipeline_mode = #tpu.pipeline_mode<synchronous>, transform_indices = @transform_2, window_bounds = array<i64: 1, 8>}, {pipeline_mode = #tpu.pipeline_mode<synchronous>, transform_indices = @transform_3, window_bounds = array<i64: 8, 4>}, {pipeline_mode = #tpu.pipeline_mode<synchronous>, transform_indices = @transform_4, window_bounds = array<i64: 1, 4>}, {transform_indices = @transform_5, window_bounds = array<i64: 8, 4>}]} {
    %c0 = arith.constant 0 : index
    %c0_0 = arith.constant 0 : index
    %0 = vector.load %arg1[%c0, %c0_0] : memref<8x32xf32, #tpu.memory_space<vmem>>, vector<8x32xf32>
    %c0_1 = arith.constant 0 : index
    %c0_2 = arith.constant 0 : index
    %1 = vector.load %arg2[%c0_1, %c0_2] : memref<32x8xf32, #tpu.memory_space<vmem>>, vector<32x8xf32>
    %cst = arith.constant dense<0.000000e+00> : vector<8x8xf32>
    %2 = tpu.matmul %0, %1, %cst {dimension_numbers = #tpu.dot_dimension_numbers<[1], [0], [0], [1], [0, 0, 1, 1], [], []>} : vector<8x32xf32>, vector<32x8xf32>, vector<8x8xf32> -> vector<8x8xf32>
    %c0_3 = arith.constant 0 : index
    %c0_4 = arith.constant 0 : index
    %3 = vector.load %arg3[%c0_3, %c0_4] : memref<1x8xf32, #tpu.memory_space<vmem>>, vector<1x8xf32>
    %4 = vector.broadcast %3 : vector<1x8xf32> to vector<8x8xf32>
    %5 = arith.addf %2, %4 : vector<8x8xf32>
    %cst_5 = arith.constant 0.000000e+00 : f32
    %6 = vector.broadcast %cst_5 : f32 to vector<8x8xf32>
    %7 = arith.maximumf %5, %6 : vector<8x8xf32>
    %c0_6 = arith.constant 0 : index
    %c0_7 = arith.constant 0 : index
    %8 = vector.load %arg4[%c0_6, %c0_7] : memref<8x4xf32, #tpu.memory_space<vmem>>, vector<8x4xf32>
    %cst_8 = arith.constant dense<0.000000e+00> : vector<8x4xf32>
    %9 = tpu.matmul %7, %8, %cst_8 {dimension_numbers = #tpu.dot_dimension_numbers<[1], [0], [0], [1], [0, 0, 1, 1], [], []>} : vector<8x8xf32>, vector<8x4xf32>, vector<8x4xf32> -> vector<8x4xf32>
    %c0_9 = arith.constant 0 : index
    %c0_10 = arith.constant 0 : index
    %10 = vector.load %arg5[%c0_9, %c0_10] : memref<1x4xf32, #tpu.memory_space<vmem>>, vector<1x4xf32>
    %11 = vector.broadcast %10 : vector<1x4xf32> to vector<8x4xf32>
    %12 = arith.addf %9, %11 : vector<8x4xf32>
    %c0_11 = arith.constant 0 : index
    %c0_12 = arith.constant 0 : index
    %13 = vector.load %arg6[%c0_11, %c0_12] : memref<8x4xf32, #tpu.memory_space<vmem>>, vector<8x4xf32>
    tpu.vector_store %arg6[%c0_11, %c0_12], %12 {strides = array<i32>} : memref<8x4xf32, #tpu.memory_space<vmem>>, vector<8x4xf32>,
    return
  }
  func.func @transform_0(%arg0: i32) -> (i32, i32) {
    %c0_i32 = arith.constant 0 : i32
    %c0_i32_0 = arith.constant 0 : i32
    return %arg0, %c0_i32 : i32, i32
  }
  func.func @transform_1(%arg0: i32) -> (i32, i32) {
    %c0_i32 = arith.constant 0 : i32
    %c0_i32_0 = arith.constant 0 : i32
    %c0_i32_1 = arith.constant 0 : i32
    return %c0_i32, %c0_i32_0 : i32, i32
  }
  func.func @transform_2(%arg0: i32) -> (i32, i32) {
    %c0_i32 = arith.constant 0 : i32
    %c0_i32_0 = arith.constant 0 : i32
    %c0_i32_1 = arith.constant 0 : i32
    return %c0_i32, %c0_i32_0 : i32, i32
  }
  func.func @transform_3(%arg0: i32) -> (i32, i32) {
    %c0_i32 = arith.constant 0 : i32
    %c0_i32_0 = arith.constant 0 : i32
    %c0_i32_1 = arith.constant 0 : i32
    return %c0_i32, %c0_i32_0 : i32, i32
  }
  func.func @transform_4(%arg0: i32) -> (i32, i32) {
    %c0_i32 = arith.constant 0 : i32
    %c0_i32_0 = arith.constant 0 : i32
    %c0_i32_1 = arith.constant 0 : i32
    return %c0_i32, %c0_i32_0 : i32, i32
  }
  func.func @transform_5(%arg0: i32) -> (i32, i32) {
    %c0_i32 = arith.constant 0 : i32
    %c0_i32_0 = arith.constant 0 : i32
    return %arg0, %c0_i32 : i32, i32
  }
}

</mosaic_0001>

<bundles_post_ra>
// kernel: _metanet_forward.1
= control target key start
LH: loop header
LB: loop body
LE: loop exit
PB: predicated region body
PF: predicated region fallthrough
CT: control target
= control target key end

     0   :  { %v231_v0 = vmov 0.0|0.0   ;;  %vm232_vm0 = vmmov 0   ;;  %v233_v4 = vmov 0.0   ;;  %vm32_vm1 = vcmask 261120   ;;  %s291_s1 = inlined_call_operand.vmem [shape: f32[32,8], index: 1, kind: input, shape index: {}]   ;;  %s292_s0 = inlined_call_operand.vmem [shape: f32[8,32], index: 0, kind: input, shape index: {}]   ;;  %s293_s3 = inlined_call_operand.vmem [shape: f32[8,4], index: 3, kind: input, shape index: {}]   ;;  %s294_s2 = inlined_call_operand.vmem [shape: f32[1,8], index: 2, kind: input, shape index: {}]   ;;  %s295_s4 = inlined_call_operand.vmem [shape: f32[1,4], index: 4, kind: input, shape index: {}]   ;;  %s296_s5 = inlined_call_operand.vmem [shape: f32[8,4], index: 5, kind: output, shape index: {}]  }
   0x1   :  { %222 = vmatprep.subr.bf16.mxu0 %v231_v0  ;;  %v21_v1 = vld [vmem:[%s291_s1] sm:$0xff]  ;;  %v22_v2 = vld [vmem:[%s291_s1 + $0x8] sm:$0xff]  ;;  %v23_v3 = vld [vmem:[%s291_s1 + $0x10] sm:$0xff]  ;;  %214 = vmatprep.mubr.msk.f32.mxu0 %vm232_vm0, %v233_v4  ;;  %vm115_vm2 = vcmask 64512   ;;  %vm189_vm3 = vcmask 31744  }
   0x2   :  { %v223_v5 = vpack.c.bf16 %v22_v2, %v21_v1  ;;  %v24_v6 = vld [vmem:[%s291_s1 + $0x18] sm:$0xff]  ;;  %217 = vmatprep.subr.mxu1 %v233_v4  ;;  %219 = vmatprep.mubr.msk.f32.mxu1 %vm232_vm0, %v233_v4  ;;  %v20_v8 = vld [vmem:[%s292_s0] sm:$0xff] }
   0x3   :  { %v226_v7 = vpack.c.bf16 %v24_v6, %v23_v3  ;;  %v107_v9 = vld [vmem:[%s293_s3] sm:$0xff] }
   0x4   :  { %224 = vmatpush3.bf16.msra.mxu0 %v223_v5  ;;  %218 = vmatpush3.msra.mxu1 %v107_v9  ;;  %v195_v10 = vld [vmem:[%s294_s2] ss:$0 sm:$0xff] }
   0x5   :  { %225 = vmatprep.subr.bf16.mxu0 %v231_v0  ;;  %v197_v15 = vld [vmem:[%s295_s4] ss:$0 sm:$0xff] }
   0x8   :  { %227 = vmatpush3.bf16.msra.mxu0 %v226_v7 }
   0xb   :  { %215 = vmatmul.mubr.msk.f32.vlgmr.msra.gmra.mrb[0].mxu0 %vm32_vm1, %v20_v8 }
  0xde   :  { %v102_v11 = vpop.f32.mrb[0].mxu0 }
  0xdf   :  { %v103_v12 = vadd.f32 %v195_v10, %v102_v11  ;;  %v216_v13 = vpop.f32.mrb[1].mxu0 }
  0xe1   :  { %v106_v14 = vmax.f32 %v103_v12, 0.0 }
  0xe3   :  { %220 = vmatmul.mubr.msk.f32.vlgmr.msra.gmra.mrb[0].mxu1 %vm115_vm2, %v106_v14 }
 0x1b6   :  { %v185_v16 = vpop.f32.mrb[0].mxu1 }
 0x1b7   :  { %v186_v17 = vadd.f32 %v197_v15, %v185_v16  ;;  %v221_v18 = vpop.f32.mrb[1].mxu1 }
 0x1b9   :  { %190 = vst.msk [vmem:[%s296_s5] sm:$0xff] %vm189_vm3, %v186_v17 }

// kernel: _metanet_forward.1
= control target key start
LH: loop header
LB: loop body
LE: loop exit
PB: predicated region body
PF: predicated region fallthrough
CT: control target
= control target key end

     0   :  { %v231_v0 = vmov 0.0|0.0   ;;  %vm232_vm0 = vmmov 0   ;;  %v233_v4 = vmov 0.0   ;;  %vm32_vm1 = vcmask 261120   ;;  %s291_s1 = inlined_call_operand.vmem [shape: f32[32,8], index: 1, kind: input, shape index: {}]   ;;  %s292_s0 = inlined_call_operand.vmem [shape: f32[8,32], index: 0, kind: input, shape index: {}]   ;;  %s293_s3 = inlined_call_operand.vmem [shape: f32[8,4], index: 3, kind: input, shape index: {}]   ;;  %s294_s2 = inlined_call_operand.vmem [shape: f32[1,8], index: 2, kind: input, shape index: {}]   ;;  %s295_s4 = inlined_call_operand.vmem [shape: f32[1,4], index: 4, kind: input, shape index: {}]   ;;  %s296_s5 = inlined_call_operand.vmem [shape: f32[8,4], index: 5, kind: output, shape index: {}]  }
   0x1   :  { %222 = vmatprep.subr.bf16.mxu0 %v231_v0  ;;  %v21_v1 = vld [vmem:[%s291_s1] sm:$0xff]  ;;  %v22_v2 = vld [vmem:[%s291_s1 + $0x8] sm:$0xff]  ;;  %v23_v3 = vld [vmem:[%s291_s1 + $0x10] sm:$0xff]  ;;  %214 = vmatprep.mubr.msk.f32.mxu0 %vm232_vm0, %v233_v4  ;;  %vm115_vm2 = vcmask 64512   ;;  %vm189_vm3 = vcmask 31744  }
   0x2   :  { %v223_v5 = vpack.c.bf16 %v22_v2, %v21_v1  ;;  %v24_v6 = vld [vmem:[%s291_s1 + $0x18] sm:$0xff]  ;;  %217 = vmatprep.subr.mxu1 %v233_v4  ;;  %219 = vmatprep.mubr.msk.f32.mxu1 %vm232_vm0, %v233_v4  ;;  %v20_v8 = vld [vmem:[%s292_s0] sm:$0xff] }
   0x3   :  { %v226_v7 = vpack.c.bf16 %v24_v6, %v23_v3  ;;  %v107_v9 = vld [vmem:[%s293_s3] sm:$0xff] }
   0x4   :  { %224 = vmatpush3.bf16.msra.mxu0 %v223_v5  ;;  %218 = vmatpush3.msra.mxu1 %v107_v9  ;;  %v195_v10 = vld [vmem:[%s294_s2] ss:$0 sm:$0xff] }
   0x5   :  { %225 = vmatprep.subr.bf16.mxu0 %v231_v0  ;;  %v197_v15 = vld [vmem:[%s295_s4] ss:$0 sm:$0xff] }
   0x8   :  { %227 = vmatpush3.bf16.msra.mxu0 %v226_v7 }
   0xb   :  { %215 = vmatmul.mubr.msk.f32.vlgmr.msra.gmra.mrb[0].mxu0 %vm32_vm1, %v20_v8 }
  0xde   :  { %v102_v11 = vpop.f32.mrb[0].mxu0 }
  0xdf   :  { %v103_v12 = vadd.f32 %v195_v10, %v102_v11  ;;  %v216_v13 = vpop.f32.mrb[1].mxu0 }
  0xe1   :  { %v106_v14 = vmax.f32 %v103_v12, 0.0 }
  0xe3   :  { %220 = vmatmul.mubr.msk.f32.vlgmr.msra.gmra.mrb[0].mxu1 %vm115_vm2, %v106_v14 }
 0x1b6   :  { %v185_v16 = vpop.f32.mrb[0].mxu1 }
 0x1b7   :  { %v186_v17 = vadd.f32 %v197_v15, %v185_v16  ;;  %v221_v18 = vpop.f32.mrb[1].mxu1 }
 0x1b9   :  { %190 = vst.msk [vmem:[%s296_s5] sm:$0xff] %vm189_vm3, %v186_v17 }

</bundles_post_ra>
